<compile_context>
chip_gen: v7x
topology: tpu7x:2x2x1
jax: 0.10.0
libtpu: 0.0.40
codegen_flags: <defaults>
</compile_context>

<pallas_src>
import math

import jax
import jax.numpy as jnp
from jax.experimental import pallas as pl
from jax.experimental.pallas import tpu as pltpu


def _rotary_kernel(xyz_ref, p_ref, q_ref, k_ref, qo_ref, ko_ref):
    # Normalize xyz and expand to per-lane angles with a tiny projection matmul:
    # ang[n, g*D + d] = (xyz[n*fold+g, axis(d)] / 1.1 + 0.5) * freqs[freq(d)]
    xn = xyz_ref[...].astype(jnp.float32) / 1.1 + 0.5                 # (T, 3*fold)
    ang = jnp.dot(xn, p_ref[...], preferred_element_type=jnp.float32)  # (T, L)
    z_sin = jnp.sin(ang)
    z_cos = jnp.cos(ang)

    L = qo_ref.shape[-1]
    lane = jax.lax.broadcasted_iota(jnp.int32, (1, L), 1)
    is_even = (lane & 1) == 0
    sgn = jnp.where(is_even, 1.0, -1.0).astype(jnp.float32)  # +1 even lane, -1 odd lane

    # Direction-agnostic pair swap: at every lane exactly one of roll(+1) /
    # roll(L-1) sources the pair partner (lane ^ 1); pick it via a rolled iota
    # so correctness does not depend on the rotate direction convention.
    partner = lane ^ 1
    fwd_src = pltpu.roll(lane, 1, axis=1)
    use_fwd = fwd_src == partner

    def rotate(x_ref, o_ref):
        x = x_ref[...].astype(jnp.float32)
        # t = +q*sin on even lanes, -q*sin on odd lanes; swapping within each
        # pair then yields exactly rotate_half(q) * z_sin.
        t = x * z_sin * sgn
        swap = jnp.where(
            use_fwd,
            pltpu.roll(t, 1, axis=1),
            pltpu.roll(t, L - 1, axis=1),
        )
        o_ref[...] = (x * z_cos + swap).astype(o_ref.dtype)

    rotate(q_ref, qo_ref)
    rotate(k_ref, ko_ref)


def _fold_for(dim):
    return 128 // dim if (dim <= 128 and 128 % dim == 0) else 1


def make_point_rotary_params(dim):
    """Deterministic buffers matching PointRotaryEmbedding.__init__.

    Returns (freqs, P, fold) where P is the (3*fold, fold*dim) angle-projection
    matrix for the row-folded (lane-dense) layout.
    """
    assert dim % 2 == 0, "dim must be even (pairwise rotation)"
    fold = _fold_for(dim)

    freqs = jnp.exp(
        jnp.arange(0, math.ceil(dim / 3), 2, dtype=jnp.float32)
        * (-math.log(10000.0) / (dim / 3))
    )
    n_freq = freqs.shape[0]

    # z[..., d] = f(xyz[..., d // (2C)]) * freqs[(d % (2C)) // 2]  (trunc to dim)
    d_idx = jnp.arange(dim)
    axis_idx = d_idx // (2 * n_freq)
    freq_idx = (d_idx % (2 * n_freq)) // 2

    g = jnp.arange(fold)
    rows = (g[:, None] * 3 + axis_idx[None, :]).reshape(-1)       # xyz column per lane
    lanes = (g[:, None] * dim + d_idx[None, :]).reshape(-1)       # folded lane index
    vals = jnp.tile(freqs[freq_idx], fold)
    P = jnp.zeros((3 * fold, fold * dim), jnp.float32).at[rows, lanes].set(vals)
    return freqs, P, fold


def point_rotary_forward(xyz, q, k, P, tile=2048):
    """Pallas-backed forward.  xyz: [..., 3], q/k: [..., D]."""
    dim = q.shape[-1]
    lead = q.shape[:-1]
    N = int(math.prod(lead)) if lead else 1

    fold = P.shape[0] // 3
    L = P.shape[1]
    assert L == fold * dim, "P does not match feature dim"

    xyz2 = xyz.reshape(N, 3)
    q2 = q.reshape(N, dim)
    k2 = k.reshape(N, dim)

    # Only pad to a multiple of `fold` (so lane-folding never mixes unrelated
    # points across a group); no tile-sized padding -- the grid uses cdiv and
    # Pallas masks the partial boundary block.
    pad = (-N) % fold
    if pad:
        xyz2 = jnp.pad(xyz2, ((0, pad), (0, 0)))
        q2 = jnp.pad(q2, ((0, pad), (0, 0)))
        k2 = jnp.pad(k2, ((0, pad), (0, 0)))
    Nf = (N + pad) // fold

    xyzf = xyz2.reshape(Nf, 3 * fold)   # contiguous reshape: no HBM copy
    qf = q2.reshape(Nf, L)
    kf = k2.reshape(Nf, L)

    # Row-tile selection: as large as allowed (sweep 2048-8192), 8-aligned or
    # equal to the full row extent.
    t = min(tile, Nf)
    if t != Nf and t % 8 != 0:
        t = max(8, (t // 8) * 8)
    t = min(t, Nf)
    grid = (pl.cdiv(Nf, t),)

    qo, ko = pl.pallas_call(
        _rotary_kernel,
        out_shape=(
            jax.ShapeDtypeStruct((Nf, L), q.dtype),
            jax.ShapeDtypeStruct((Nf, L), k.dtype),
        ),
        grid_spec=pltpu.PrefetchScalarGridSpec(
            num_scalar_prefetch=0,
            grid=grid,
            in_specs=[
                pl.BlockSpec((t, 3 * fold), lambda i: (i, 0)),   # folded xyz rows
                pl.BlockSpec((3 * fold, L), lambda i: (0, 0)),   # angle projection P
                pl.BlockSpec((t, L), lambda i: (i, 0)),          # q rows (lane-dense)
                pl.BlockSpec((t, L), lambda i: (i, 0)),          # k rows (lane-dense)
            ],
            out_specs=[
                pl.BlockSpec((t, L), lambda i: (i, 0)),
                pl.BlockSpec((t, L), lambda i: (i, 0)),
            ],
        ),
        compiler_params=pltpu.CompilerParams(
            dimension_semantics=("parallel",),   # lets v7x shard the row grid on 2 TCs
        ),
    )(xyzf, P, qf, kf)

    qo = qo.reshape(Nf * fold, dim)[:N].reshape(*lead, dim)
    ko = ko.reshape(Nf * fold, dim)[:N].reshape(*lead, dim)
    return qo, ko


def _reference_forward(xyz, q, k, freqs, dim):
    """Pure-JAX transliteration of the PyTorch module for verification."""
    xyz = xyz / 1.1 + 0.5
    xyz_f = xyz[..., :, None] * freqs                                    # [..., 3, C]
    z_sin = jnp.repeat(jnp.sin(xyz_f), 2, axis=-1).reshape(*xyz.shape[:-1], -1)[..., :dim]
    z_cos = jnp.repeat(jnp.cos(xyz_f), 2, axis=-1).reshape(*xyz.shape[:-1], -1)[..., :dim]

    def rot(x):
        return jnp.stack([-x[..., 1::2], x[..., ::2]], -1).reshape(*x.shape[:-1], -1)

    q_out = q * z_cos + rot(q) * z_sin
    k_out = k * z_cos + rot(k) * z_sin
    return q_out, k_out


if __name__ == "__main__":
    dim = 32  # feature dim D (even); divides 128 so 4 points fold per lane group

    freqs, P, fold = make_point_rotary_params(dim)

    def check(lead_shape, tile, tag):
        key = jax.random.PRNGKey(0)
        k_xyz, k_q, k_k = jax.random.split(key, 3)
        xyz = jax.random.uniform(k_xyz, (*lead_shape, 3), jnp.float32, -1.0, 1.0)
        q = jax.random.normal(k_q, (*lead_shape, dim), jnp.float32)
        k = jax.random.normal(k_k, (*lead_shape, dim), jnp.float32)

        q_out, k_out = point_rotary_forward(xyz, q, k, P, tile=tile)
        q_out, k_out = jax.block_until_ready((q_out, k_out))

        q_ref, k_ref = _reference_forward(xyz, q, k, freqs, dim)
        assert jnp.allclose(q_out, q_ref, atol=1e-5, rtol=1e-5), f"q mismatch: {tag}"
        assert jnp.allclose(k_out, k_ref, atol=1e-5, rtol=1e-5), f"k mismatch: {tag}"

    # small single-block case (tile clamps to the folded row count)
    check((2, 64), tile=2048, tag="single-block")
    # multi-block grid with lane-dense 128-wide rows (4 grid steps)
    check((2, 256), tile=32, tag="multi-block")
    # N not a multiple of the fold factor -> exercises the fold-pad / slice path
    check((1, 67), tile=2048, tag="fold-pad")

    print("KERNEL_OK")
</pallas_src>

<mosaic_0001>
module attributes {stable_mosaic.version = 11 : i64} {
  func.func @_rotary_kernel(%arg0: i32, %arg1: memref<32x12xf32, #tpu.memory_space<vmem>>, %arg2: memref<12x128xf32, #tpu.memory_space<vmem>>, %arg3: memref<32x128xf32, #tpu.memory_space<vmem>>, %arg4: memref<32x128xf32, #tpu.memory_space<vmem>>, %arg5: memref<32x128xf32, #tpu.memory_space<vmem>>, %arg6: memref<32x128xf32, #tpu.memory_space<vmem>>) attributes {dimension_semantics = [#tpu.dimension_semantics<parallel>], iteration_bounds = array<i64: 1>, scalar_prefetch = 0 : i64, scratch_operands = 0 : i64, tpu.core_type = #tpu.core_type<tc>, window_params = [{transform_indices = @transform_0, window_bounds = array<i64: 32, 12>}, {pipeline_mode = #tpu.pipeline_mode<synchronous>, transform_indices = @transform_1, window_bounds = array<i64: 12, 128>}, {transform_indices = @transform_2, window_bounds = array<i64: 32, 128>}, {transform_indices = @transform_3, window_bounds = array<i64: 32, 128>}, {transform_indices = @transform_4, window_bounds = array<i64: 32, 128>}, {transform_indices = @transform_5, window_bounds = array<i64: 32, 128>}]} {
    %c0 = arith.constant 0 : index
    %c0_0 = arith.constant 0 : index
    %0 = vector.load %arg1[%c0, %c0_0] : memref<32x12xf32, #tpu.memory_space<vmem>>, vector<32x12xf32>
    %cst = arith.constant 1.100000e+00 : f32
    %1 = vector.broadcast %cst : f32 to vector<32x12xf32>
    %2 = arith.divf %0, %1 : vector<32x12xf32>
    %cst_1 = arith.constant 5.000000e-01 : f32
    %3 = vector.broadcast %cst_1 : f32 to vector<32x12xf32>
    %4 = arith.addf %2, %3 : vector<32x12xf32>
    %c0_2 = arith.constant 0 : index
    %c0_3 = arith.constant 0 : index
    %5 = vector.load %arg2[%c0_2, %c0_3] : memref<12x128xf32, #tpu.memory_space<vmem>>, vector<12x128xf32>
    %cst_4 = arith.constant dense<0.000000e+00> : vector<32x128xf32>
    %6 = tpu.matmul %4, %5, %cst_4 {dimension_numbers = #tpu.dot_dimension_numbers<[1], [0], [0], [1], [0, 0, 1, 1], [], []>} : vector<32x12xf32>, vector<12x128xf32>, vector<32x128xf32> -> vector<32x128xf32>
    %7 = math.sin %6 : vector<32x128xf32>
    %8 = math.cos %6 : vector<32x128xf32>
    %9 = tpu.iota {dimensions = array<i32: 1>} : vector<1x128xi32>
    %c1_i32 = arith.constant 1 : i32
    %10 = vector.broadcast %c1_i32 : i32 to vector<1x128xi32>
    %11 = arith.andi %9, %10 : vector<1x128xi32>
    %c0_i32 = arith.constant 0 : i32
    %12 = vector.broadcast %c0_i32 : i32 to vector<1x128xi32>
    %13 = arith.cmpi eq, %11, %12 : vector<1x128xi32>
    %cst_5 = arith.constant 1.000000e+00 : f32
    %cst_6 = arith.constant -1.000000e+00 : f32
    %14 = vector.broadcast %cst_5 : f32 to vector<1x128xf32>
    %15 = vector.broadcast %cst_6 : f32 to vector<1x128xf32>
    %16 = arith.select %13, %14, %15 : vector<1x128xi1>, vector<1x128xf32>
    %c1_i32_7 = arith.constant 1 : i32
    %17 = vector.broadcast %c1_i32_7 : i32 to vector<1x128xi32>
    %18 = arith.xori %9, %17 : vector<1x128xi32>
    %c1_i32_8 = arith.constant 1 : i32
    %19 = tpu.dynamic_rotate %9 by %c1_i32_8 dim 1 : vector<1x128xi32>, i32 -> vector<1x128xi32>
    %20 = arith.cmpi eq, %19, %18 : vector<1x128xi32>
    %c0_9 = arith.constant 0 : index
    %c0_10 = arith.constant 0 : index
    %21 = vector.load %arg3[%c0_9, %c0_10] : memref<32x128xf32, #tpu.memory_space<vmem>>, vector<32x128xf32>
    %22 = arith.mulf %21, %7 : vector<32x128xf32>
    %23 = vector.broadcast %16 : vector<1x128xf32> to vector<32x128xf32>
    %24 = arith.mulf %22, %23 : vector<32x128xf32>
    %c1_i32_11 = arith.constant 1 : i32
    %25 = tpu.dynamic_rotate %24 by %c1_i32_11 dim 1 : vector<32x128xf32>, i32 -> vector<32x128xf32>
    %c127_i32 = arith.constant 127 : i32
    %26 = tpu.dynamic_rotate %24 by %c127_i32 dim 1 : vector<32x128xf32>, i32 -> vector<32x128xf32>
    %27 = vector.shape_cast %20 : vector<1x128xi1> to vector<1x128xi1>
    %28 = vector.broadcast %27 : vector<1x128xi1> to vector<32x128xi1>
    %29 = arith.select %28, %25, %26 : vector<32x128xi1>, vector<32x128xf32>
    %30 = arith.mulf %21, %8 : vector<32x128xf32>
    %31 = arith.addf %30, %29 : vector<32x128xf32>
    %c0_12 = arith.constant 0 : index
    %c0_13 = arith.constant 0 : index
    %32 = vector.load %arg5[%c0_12, %c0_13] : memref<32x128xf32, #tpu.memory_space<vmem>>, vector<32x128xf32>
    tpu.vector_store %arg5[%c0_12, %c0_13], %31 {strides = array<i32>} : memref<32x128xf32, #tpu.memory_space<vmem>>, vector<32x128xf32>,
    %c0_14 = arith.constant 0 : index
    %c0_15 = arith.constant 0 : index
    %33 = vector.load %arg4[%c0_14, %c0_15] : memref<32x128xf32, #tpu.memory_space<vmem>>, vector<32x128xf32>
    %34 = arith.mulf %33, %7 : vector<32x128xf32>
    %35 = vector.broadcast %16 : vector<1x128xf32> to vector<32x128xf32>
    %36 = arith.mulf %34, %35 : vector<32x128xf32>
    %c1_i32_16 = arith.constant 1 : i32
    %37 = tpu.dynamic_rotate %36 by %c1_i32_16 dim 1 : vector<32x128xf32>, i32 -> vector<32x128xf32>
    %c127_i32_17 = arith.constant 127 : i32
    %38 = tpu.dynamic_rotate %36 by %c127_i32_17 dim 1 : vector<32x128xf32>, i32 -> vector<32x128xf32>
    %39 = vector.shape_cast %20 : vector<1x128xi1> to vector<1x128xi1>
    %40 = vector.broadcast %39 : vector<1x128xi1> to vector<32x128xi1>
    %41 = arith.select %40, %37, %38 : vector<32x128xi1>, vector<32x128xf32>
    %42 = arith.mulf %33, %8 : vector<32x128xf32>
    %43 = arith.addf %42, %41 : vector<32x128xf32>
    %c0_18 = arith.constant 0 : index
    %c0_19 = arith.constant 0 : index
    %44 = vector.load %arg6[%c0_18, %c0_19] : memref<32x128xf32, #tpu.memory_space<vmem>>, vector<32x128xf32>
    tpu.vector_store %arg6[%c0_18, %c0_19], %43 {strides = array<i32>} : memref<32x128xf32, #tpu.memory_space<vmem>>, vector<32x128xf32>,
    return
  }
  func.func @transform_0(%arg0: i32) -> (i32, i32) {
    %c0_i32 = arith.constant 0 : i32
    %c0_i32_0 = arith.constant 0 : i32
    return %arg0, %c0_i32 : i32, i32
  }
  func.func @transform_1(%arg0: i32) -> (i32, i32) {
    %c0_i32 = arith.constant 0 : i32
    %c0_i32_0 = arith.constant 0 : i32
    %c0_i32_1 = arith.constant 0 : i32
    return %c0_i32, %c0_i32_0 : i32, i32
  }
  func.func @transform_2(%arg0: i32) -> (i32, i32) {
    %c0_i32 = arith.constant 0 : i32
    %c0_i32_0 = arith.constant 0 : i32
    return %arg0, %c0_i32 : i32, i32
  }
  func.func @transform_3(%arg0: i32) -> (i32, i32) {
    %c0_i32 = arith.constant 0 : i32
    %c0_i32_0 = arith.constant 0 : i32
    return %arg0, %c0_i32 : i32, i32
  }
  func.func @transform_4(%arg0: i32) -> (i32, i32) {
    %c0_i32 = arith.constant 0 : i32
    %c0_i32_0 = arith.constant 0 : i32
    return %arg0, %c0_i32 : i32, i32
  }
  func.func @transform_5(%arg0: i32) -> (i32, i32) {
    %c0_i32 = arith.constant 0 : i32
    %c0_i32_0 = arith.constant 0 : i32
    return %arg0, %c0_i32 : i32, i32
  }
}

</mosaic_0001>

<bundles_post_ra>
// kernel: tpu_custom_call.1
= control target key start
LH: loop header
LB: loop body
LE: loop exit
PB: predicated region body
PF: predicated region fallthrough
CT: control target
= control target key end

     0   :  { %11 = vsyncpa [#allocation3], 0  ;;  %s1830_s0 = inlined_call_operand.vmem [shape: f32[32,12], index: 0, kind: input, shape index: {}]   ;;  %s1831_s1 = inlined_call_operand.vmem [shape: f32[12,128], index: 1, kind: input, shape index: {}]   ;;  %s1832_s2 = inlined_call_operand.vmem [shape: f32[32,128], index: 2, kind: input, shape index: {}]   ;;  %s1833_s3 = inlined_call_operand.hbm [shape: f32[32,128], index: 3, kind: input, shape index: {}]   ;;  %s1834_s4 = inlined_call_operand.hbm [shape: f32[32,128], index: 4, kind: output, shape index: {0}]   ;;  %s1835_s5 = inlined_call_operand.hbm [shape: f32[32,128], index: 5, kind: output, shape index: {1}]  }
   0x1   :  { %12 = vsyncpa [#allocation4], 0 }
   0x2   :  { %13 = vsyncpa [#allocation7], 0  ;;  %s1297_s18 = smov [#allocation2]   ;;  %s1225_s22 = scalar_lea.hbm %s1833_s3, 512 }
   0x3   :  { %s25_s19 = sshll.u32 %s1297_s18, 4  ;;  %p1226_p0 = scmp.ne.s32.totalorder %s1833_s3, %s1225_s22  ;;  %s26_s19 = int_to_ptr.vmem [resolvable:$true] %s25_s19 }
   0x4   :  { %p1229_p1 = scmp.lt.u32.totalorder %s1225_s22, %s1833_s3 }
   0x6   :  { %p1231_p2 = pnand %p1229_p1, %p1226_p0 }
   0x8   :  { %1234 = shalt.err (!%p1231_p2)
}
   0x9   :  { %s1235_s27 = scalar_lea.vmem %s26_s19, 512  ;;  %p1240_p4 = scmp.lt.s32.totalorder %s26_s19, %s26_s19 }
   0xa   :  { %p1236_p3 = scmp.ne.s32.totalorder %s26_s19, %s1235_s27  ;;  %p1241_p5 = scmp.lt.s32.totalorder %s1235_s27, %s1235_s27 }
   0xc   :  { %p1242_p6 = por %p1241_p5, %p1240_p4 }
   0xe   :  { %p1243_p7 = pnand %p1242_p6, %p1236_p3 }
  0x10   :  { %1246 = shalt.err (!%p1243_p7)
}
  0x11   :  { %s1298_s28 = smov 128   ;;  %s1299_s29 = smov 8  }
  0x12   :  { %31 = dma.hbm_to_vmem [thread:$0]  %s1833_s3, 512, %s26_s19, [#allocation3], %s1298_s28, %s1298_s28, %s1299_s29  }
  0x13   :  { %1291 = dma.done.wait [#allocation3], 512  }
  0x14   :  { %1292 = vsyncadd [#allocation3], 4294966784  ;;  %vm63_vm0 = vcmask 1043456   ;;  %vm1300_vm1 = vmmov 1   ;;  %v48_v1 = vld [vmem:[%s1831_s1] sm:$0xff]  ;;  %vm50_vm3 = vcmask 97280  }
  0x15   :  { %vm1358_vm2 = vmpackc.low %vm63_vm0, %vm1300_vm1  ;;  %v49_v2 = vld [vmem:[%s1831_s1 + $0x8] sm:$0xf]  ;;  %v35_v3 = vld [vmem:[%s1830_s0] sm:$0xff]  ;;  %v1301_v47 = vmov 683565275   ;;  %s1309_s21 = smov 127  }
  0x16   :  { %v1169_v4 = vpack.c.bf16 %v49_v2, %v48_v1  ;;  %v40_v5 = vmul.f32 0.9090909, %v35_v3  ;;  %v37_v6 = vld [vmem:[%s1830_s0 + $0x10] sm:$0xff]  ;;  %v36_v7 = vld [vmem:[%s1830_s0 + $0x8] sm:$0xff]  ;;  %v38_v8 = vld [vmem:[%s1830_s0 + $0x18] sm:$0xff]  ;;  %s1307_s0 = smov 1  }
  0x17   :  { %v42_v9 = vmul.f32 0.9090909, %v37_v6  ;;  %v41_v10 = vmul.f32 0.9090909, %v36_v7  ;;  %v43_v11 = vmul.f32 0.9090909, %v38_v8 }
  0x18   :  { %1171 = vmatprep.subr.msk.bf16.mxu0 %vm1358_vm2, %v1169_v4  ;;  %1175 = vmatprep.subr.msk.bf16.mxu1 %vm1358_vm2, %v1169_v4  ;;  %v44_v12 = vadd.f32 0.5, %v40_v5  ;;  %v1302_v51 = vmov 2475754826   ;;  %v1303_v53 = vmov 2131351028  }
  0x19   :  { %1174 = vmatpush3.bf16.msk.msra.mxu0 %vm1358_vm2, %v1169_v4  ;;  %1176 = vmatpush3.bf16.msk.msra.mxu1 %vm1358_vm2, %v1169_v4  ;;  %v46_v13 = vadd.f32 0.5, %v42_v9  ;;  %v45_v14 = vadd.f32 0.5, %v41_v10  ;;  %v47_v15 = vadd.f32 0.5, %v43_v11  ;;  %v1304_v55 = vmov 2102212464  }
  0x1a   :  { %1163 = vmatprep.mubr.msk.f32.mxu0 %vm50_vm3, %v44_v12  ;;  %v1305_v57 = vmov 920167782   ;;  %v1306_v0 = vmov 1326507024  }
  0x1b   :  { %1166 = vmatprep.mubr.msk.f32.mxu1 %vm50_vm3, %v46_v13 }
  0x1c   :  { %1164 = vmatmul.mubr.msk.f32.vlgmr.msra.gmra.mrb[0].mxu0 %vm50_vm3, %v45_v14  ;;  %1167 = vmatmul.mubr.msk.f32.vlgmr.msra.gmra.mrb[0].mxu1 %vm50_vm3, %v47_v15 }
  0xef   :  { %v1392_v16 = vpop.f32.mrb[0].mxu0  ;;  %v1394_v17 = vpop.f32.mrb[0].mxu1 }
  0xf0   :  { %v256_v18 = vand.u32 2147483647, %v1392_v16  ;;  %v259_v19 = vand.u32 2139095040, %v1392_v16  ;;  %v464_v20 = vand.u32 2147483647, %v1394_v17  ;;  %v467_v21 = vand.u32 2139095040, %v1394_v17 }
  0xf1   :  { %v1400_v22 = vpop.f32.mrb[1].mxu0  ;;  %v1402_v23 = vpop.f32.mrb[1].mxu1 }
  0xf2   :  { %v260_v24 = vshrl.u32 %v259_v19, 23  ;;  %v263_v25 = vand.u32 8388607, %v256_v18  ;;  %v468_v26 = vshrl.u32 %v467_v21, 23  ;;  %v471_v27 = vand.u32 8388607, %v464_v20 }
  0xf3   :  { %v155_v28 = vand.u32 2139095040, %v1400_v22  ;;  %v152_v36 = vand.u32 2147483647, %v1400_v22 }
  0xf4   :  { %v1125_v29 = vadd.s32 4294967169, %v260_v24  ;;  %v1133_v30 = vadd.s32 4294967169, %v468_v26  ;;  %v264_v32 = vor.u32 8388608, %v263_v25  ;;  %v472_v34 = vor.u32 8388608, %v471_v27 }
  0xf5   :  { %v156_v31 = vshrl.u32 %v155_v28, 23  ;;  %v1416_v44 = vand.u32 8388607, %v152_v36 }
  0xf6   :  { %v266_v33 = vadd.s32 1, %v1125_v29  ;;  %v474_v35 = vadd.s32 1, %v1133_v30  ;;  %v1410_v42 = vshll.u32 %v264_v32, 8  ;;  %v1412_v43 = vshll.u32 %v472_v34, 8 }
  0xf7   :  { %v1121_v37 = vadd.s32 4294967169, %v156_v31 }
  0xf8   :  { %vm267_vm4 = vcmp.gt.s32.totalorder %v266_v33, 0  ;;  %vm475_vm5 = vcmp.gt.s32.totalorder %v474_v35, 0 }
  0xf9   :  { %v268_v38 = vsel %vm267_vm4, %v266_v33, 0  ;;  %v476_v41 = vsel %vm475_vm5, %v474_v35, 0  ;;  %v1418_v45 = vadd.s32 1, %v1121_v37 }
  0xfa   :  { %v269_v39 = vshrl.u32 %v268_v38, 5  ;;  %v270_v40 = vand.u32 31, %v268_v38  ;;  %v1421_v49 = vshrl.u32 %v476_v41, 5  ;;  %v478_v50 = vand.u32 31, %v476_v41 }
  0xfb   :  { %vm163_vm10 = vcmp.gt.s32.totalorder %v1418_v45, 0 }
  0xfc   :  { %v271_v46 = vsub.s32 32, %v270_v40  ;;  %v273_v48 = vshll.u32 %v1301_v47, %v270_v40  ;;  %v276_v52 = vshll.u32 %v1302_v51, %v270_v40  ;;  %v279_v54 = vshll.u32 %v1303_v53, %v270_v40 }
  0xfd   :  { %v282_v56 = vshll.u32 %v1304_v55, %v270_v40  ;;  %v285_v58 = vshll.u32 %v1305_v57, %v270_v40  ;;  %vm288_vm6 = vcmp.lt.s32.totalorder %v269_v39, 1  ;;  %vm289_vm7 = vcmp.lt.s32.totalorder %v269_v39, 2 }
  0xfe   :  { %v274_v59 = vshrl.u32 %v1302_v51, %v271_v46  ;;  %v277_v60 = vshrl.u32 %v1303_v53, %v271_v46  ;;  %v280_v61 = vshrl.u32 %v1304_v55, %v271_v46  ;;  %v272_v62 = vshrl.u32 %v1301_v47, %v271_v46 }
  0xff   :  { %v283_v63 = vshrl.u32 %v1305_v57, %v271_v46  ;;  %v286_v1 = vshrl.u32 %v1306_v0, %v271_v46  ;;  %v479_v5 = vsub.s32 32, %v478_v50  ;;  %vm290_vm8 = vcmp.lt.s32.totalorder %v269_v39, 3 }
 0x100   :  { %v275_v2 = vor.u32 %v274_v59, %v273_v48  ;;  %v278_v3 = vor.u32 %v277_v60, %v276_v52  ;;  %v281_v4 = vor.u32 %v280_v61, %v279_v54  ;;  %vm291_vm9 = vcmp.lt.s32.totalorder %v269_v39, 4 }
 0x101   :  { %v284_v6 = vor.u32 %v283_v63, %v282_v56  ;;  %v287_v7 = vor.u32 %v286_v1, %v285_v58  ;;  %v481_v15 = vshll.u32 %v1301_v47, %v478_v50  ;;  %v482_v24 = vshrl.u32 %v1302_v51, %v479_v5 }
 0x102   :  { %v292_v8 = vsel %vm288_vm6, %v272_v62, %v275_v2  ;;  %v293_v9 = vsel %vm291_vm9, %v281_v4, 2102212464  ;;  %v296_v10 = vsel %vm288_vm6, %v275_v2, %v278_v3  ;;  %v300_v11 = vsel %vm288_vm6, %v278_v3, %v281_v4 }
 0x103   :  { %v294_v12 = vsel %vm290_vm8, %v278_v3, %v293_v9  ;;  %v297_v13 = vsel %vm291_vm9, %v284_v6, 920167782  ;;  %v301_v14 = vsel %vm291_vm9, %v287_v7, 1326507024  ;;  %v484_v25 = vshll.u32 %v1302_v51, %v478_v50 }
 0x104   :  { %v298_v19 = vsel %vm290_vm8, %v281_v4, %v297_v13  ;;  %v302_v21 = vsel %vm290_vm8, %v284_v6, %v301_v14  ;;  %v295_v26 = vsel %vm289_vm7, %v292_v8, %v294_v12  ;;  %v485_v29 = vshrl.u32 %v1303_v53, %v479_v5 }
 0x105   :  { %v299_v27 = vsel %vm289_vm7, %v296_v10, %v298_v19  ;;  %v303_v28 = vsel %vm289_vm7, %v300_v11, %v302_v21  ;;  %v483_v34 = vor.u32 %v482_v24, %v481_v15  ;;  %v487_v37 = vshll.u32 %v1303_v53, %v478_v50 }
 0x106   :  { %v1445_v30 = vmul.u32.u64.low %v1410_v42, %v303_v28  ;;  %v1446_v31 = vmul.u32.u64.high %v1410_v42, %v303_v28, %v1445_v30  ;;  %v1449_v32 = vmul.u32.u64.low %v1410_v42, %v299_v27  ;;  %v1450_v33 = vmul.u32.u64.high %v1410_v42, %v299_v27, %v1449_v32 }
 0x107   :  { %v486_v35 = vor.u32 %v485_v29, %v484_v25  ;;  %v488_v38 = vshrl.u32 %v1304_v55, %v479_v5  ;;  %v480_v39 = vshrl.u32 %v1301_v47, %v479_v5  ;;  %v490_v40 = vshll.u32 %v1304_v55, %v478_v50 }
 0x108   :  { %v491_v41 = vshrl.u32 %v1305_v57, %v479_v5  ;;  %v494_v46 = vshrl.u32 %v1306_v0, %v479_v5  ;;  %v311_v48 = vmul.u32 %v1410_v42, %v295_v26  ;;  %v493_v54 = vshll.u32 %v1305_v57, %v478_v50 }
 0x109   :  { %v489_v52 = vor.u32 %v488_v38, %v487_v37  ;;  %vm496_vm11 = vcmp.lt.s32.totalorder %v1421_v49, 1  ;;  %vm313_vm12 = vc.u32 %v1446_v31, %v1449_v32  ;;  %v314_v56 = vadd.s32 1, %v1450_v33 }
 0x10a   :  { %v492_v58 = vor.u32 %v491_v41, %v490_v40  ;;  %vm497_vm13 = vcmp.lt.s32.totalorder %v1421_v49, 2  ;;  %v495_v59 = vor.u32 %v494_v46, %v493_v54  ;;  %vm498_vm14 = vcmp.lt.s32.totalorder %v1421_v49, 3 }
 0x10b   :  { %vm499_vm15 = vcmp.lt.s32.totalorder %v1421_v49, 4  ;;  %v504_v60 = vsel %vm496_vm11, %v483_v34, %v486_v35  ;;  %v315_v42 = vsel %vm313_vm12, %v314_v56, %v1450_v33  ;;  %v508_v62 = vsel %vm496_vm11, %v486_v35, %v489_v52 }
 0x10c   :  { %v501_v61 = vsel %vm499_vm15, %v489_v52, 2102212464  ;;  %v505_v50 = vsel %vm499_vm15, %v492_v58, 920167782  ;;  %v316_v63 = vadd.s32 %v315_v42, %v311_v48  ;;  %v500_v1 = vsel %vm496_vm11, %v480_v39, %v483_v34 }
 0x10d   :  { %v506_v2 = vsel %vm498_vm14, %v489_v52, %v505_v50  ;;  %v509_v3 = vsel %vm499_vm15, %v495_v59, 1326507024  ;;  %v502_v4 = vsel %vm498_vm14, %v486_v35, %v501_v61  ;;  %v164_v7 = vsel %vm163_vm10, %v1418_v45, 0 }
 0x10e   :  { %v507_v5 = vsel %vm497_vm13, %v504_v60, %v506_v2  ;;  %v510_v6 = vsel %vm498_vm14, %v492_v58, %v509_v3  ;;  %v317_v8 = vadd.s32 536870912, %v316_v63  ;;  %v360_v14 = vand.u32 2147483647, %v1402_v23 }
 0x10f   :  { %v511_v9 = vsel %vm497_vm13, %v508_v62, %v510_v6  ;;  %v1477_v10 = vmul.u32.u64.low %v1412_v43, %v507_v5  ;;  %v1478_v11 = vmul.u32.u64.high %v1412_v43, %v507_v5, %v1477_v10  ;;  %v503_v45 = vsel %vm497_vm13, %v500_v1, %v502_v4 }
 0x110   :  { %v1482_v12 = vmul.u32.u64.low %v1412_v43, %v511_v9  ;;  %v1483_v13 = vmul.u32.u64.high %v1412_v43, %v511_v9, %v1482_v12  ;;  %v1486_v15 = vshrl.u32 %v317_v8, 30  ;;  %v160_v19 = vor.u32 8388608, %v1416_v44 }
 0x111   :  { %v166_v21 = vand.u32 31, %v164_v7  ;;  %v522_v25 = vadd.s32 1, %v1478_v11  ;;  %v363_v27 = vand.u32 2139095040, %v1402_v23  ;;  %v519_v28 = vmul.u32 %v1412_v43, %v503_v45 }
 0x112   :  { %v319_v24 = vshll.u32 %v1486_v15, 30  ;;  %vm521_vm0 = vc.u32 %v1483_v13, %v1477_v10  ;;  %v1500_v30 = vshll.u32 %v160_v19, 8  ;;  %v1504_v44 = vand.u32 8388607, %v360_v14 }
 0x113   :  { %v167_v26 = vsub.s32 32, %v166_v21  ;;  %v523_v49 = vsel %vm521_vm0, %v522_v25, %v1478_v11  ;;  %v169_v34 = vshll.u32 %v1301_v47, %v166_v21  ;;  %v1510_v38 = vshrl.u32 %v164_v7, 5 }
 0x114   :  { %v1497_v29 = vsub.s32 %v316_v63, %v319_v24  ;;  %v524_v33 = vadd.s32 %v523_v49, %v519_v28  ;;  %v172_v39 = vshll.u32 %v1302_v51, %v166_v21  ;;  %v364_v40 = vshrl.u32 %v363_v27, 23 }
 0x115   :  { %v170_v35 = vshrl.u32 %v1302_v51, %v167_v26  ;;  %v173_v43 = vshrl.u32 %v1303_v53, %v167_v26  ;;  %v175_v48 = vshll.u32 %v1303_v53, %v166_v21  ;;  %v176_v52 = vshrl.u32 %v1304_v55, %v167_v26 }
 0x116   :  { %v322_v37 = vsub.s32 0, %v1497_v29  ;;  %v525_v41 = vadd.s32 536870912, %v524_v33  ;;  %v178_v58 = vshll.u32 %v1304_v55, %v166_v21  ;;  %v179_v59 = vshrl.u32 %v1305_v57, %v167_v26 }
 0x117   :  { %v171_v46 = vor.u32 %v170_v35, %v169_v34  ;;  %v174_v56 = vor.u32 %v173_v43, %v172_v39  ;;  %v177_v42 = vor.u32 %v176_v52, %v175_v48  ;;  %v181_v61 = vshll.u32 %v1305_v57, %v166_v21 }
 0x118   :  { %v1126_v54 = vmin.u32 %v322_v37, %v1497_v29  ;;  %v1518_v60 = vshrl.u32 %v525_v41, 30  ;;  %v182_v50 = vshrl.u32 %v1306_v0, %v167_v26  ;;  %v312_v62 = vadd.s32 %v1449_v32, %v1446_v31 }
 0x119   :  { %v180_v1 = vor.u32 %v179_v59, %v178_v58  ;;  %v1129_v2 = vadd.s32 4294967169, %v364_v40  ;;  %vm184_vm1 = vcmp.lt.s32.totalorder %v1510_v38, 1  ;;  %vm187_vm2 = vcmp.lt.s32.totalorder %v1510_v38, 4 }
 0x11a   :  { %v324_v63 = vclz %v1126_v54  ;;  %v527_v3 = vshll.u32 %v1518_v60, 30  ;;  %v183_v4 = vor.u32 %v182_v50, %v181_v61  ;;  %vm185_vm3 = vcmp.lt.s32.totalorder %v1510_v38, 2 }
 0x11b   :  { %vm186_vm4 = vcmp.lt.s32.totalorder %v1510_v38, 3  ;;  %v193_v6 = vsel %vm187_vm2, %v180_v1, 920167782  ;;  %v168_v31 = vshrl.u32 %v1301_v47, %v167_v26  ;;  %v192_v32 = vsel %vm184_vm1, %v171_v46, %v174_v56 }
 0x11c   :  { %v1127_v5 = vadd.s32 4294967294, %v324_v63  ;;  %v1529_v7 = vsub.s32 %v524_v33, %v527_v3  ;;  %v194_v8 = vsel %vm186_vm4, %v177_v42, %v193_v6  ;;  %v189_v9 = vsel %vm187_vm2, %v177_v42, 2102212464 }
 0x11d   :  { %v196_v11 = vsel %vm184_vm1, %v174_v56, %v177_v42  ;;  %v197_v12 = vsel %vm187_vm2, %v183_v4, 1326507024  ;;  %v188_v21 = vsel %vm184_vm1, %v168_v31, %v171_v46  ;;  %v370_v24 = vadd.s32 1, %v1129_v2 }
 0x11e   :  { %vm1128_vm5 = vcmp.lt.s32.totalorder %v1127_v5, 0  ;;  %v530_v19 = vsub.s32 0, %v1529_v7  ;;  %vm258_vm6 = vcmp.lt.s32.totalorder %v1392_v16, 0  ;;  %v195_v27 = vsel %vm185_vm3, %v192_v32, %v194_v8 }
 0x11f   :  { %v327_v45 = vsel %vm1128_vm5, 0, %v1127_v5  ;;  %v198_v28 = vsel %vm186_vm4, %v180_v1, %v197_v12  ;;  %vm466_vm7 = vcmp.lt.s32.totalorder %v1394_v17, 0  ;;  %v190_v34 = vsel %vm186_vm4, %v174_v56, %v189_v9 }
 0x120   :  { %v328_v25 = vsub.s32 32, %v327_v45  ;;  %v332_v26 = vsub.s32 4294967266, %v327_v45  ;;  %v329_v49 = vshll.u32 %v1497_v29, %v327_v45  ;;  %v1134_v33 = vmin.u32 %v530_v19, %v1529_v7 }
 0x121   :  { %v199_v35 = vsel %vm185_vm3, %v196_v11, %v198_v28  ;;  %v1558_v46 = vmul.u32.u64.low %v1500_v30, %v195_v27  ;;  %v1559_v29 = vmul.u32.u64.high %v1500_v30, %v195_v27, %v1558_v46  ;;  %vm371_vm8 = vcmp.gt.s32.totalorder %v370_v24, 0 }
 0x122   :  { %v330_v43 = vshrl.u32 %v312_v62, %v328_v25  ;;  %v333_v37 = vadd.s32 127, %v332_v26  ;;  %v1554_v39 = vmul.u32.u64.low %v1500_v30, %v199_v35  ;;  %v1555_v40 = vmul.u32.u64.high %v1500_v30, %v199_v35, %v1554_v39 }
 0x123   :  { %v532_v41 = vclz %v1134_v33  ;;  %v372_v54 = vsel %vm371_vm8, %v370_v24, 0  ;;  %v980_v56 = vlaneseq  ;;  %v342_v58 = vsub.s32 4, %v1486_v15 }
 0x124   :  { %v331_v48 = vor.u32 %v330_v43, %v329_v49  ;;  %v334_v52 = vshll.u32 %v333_v37, 23  ;;  %v191_v42 = vsel %vm185_vm3, %v188_v21, %v190_v34  ;;  %v374_v61 = vand.u32 31, %v372_v54 }
 0x125   :  { %v1135_v59 = vadd.s32 4294967294, %v532_v41  ;;  %v550_v62 = vsub.s32 4, %v1518_v60  ;;  %vm209_vm9 = vc.u32 %v1555_v40, %v1558_v46  ;;  %v368_v63 = vor.u32 8388608, %v1504_v44 }
 0x126   :  { %v335_v50 = vor.u32 4788187, %v334_v52  ;;  %vm1571_vm10 = vcmp.le.f32.partialorder %v256_v18, 0.7853982  ;;  %v520_v2 = vadd.s32 %v1477_v10, %v1483_v13  ;;  %v210_v38 = vadd.s32 1, %v1559_v29 }
 0x127   :  { %vm1136_vm11 = vcmp.lt.s32.totalorder %v1135_v59, 0  ;;  %v375_v3 = vsub.s32 32, %v374_v61  ;;  %v338_v5 = vcvt.s32.f32 %v331_v48  ;;  %v207_v31 = vmul.u32 %v1500_v30, %v191_v42 }
 0x128   :  { %v336_v4 = vand.u32 2147483647, %v335_v50  ;;  %v535_v6 = vsel %vm1136_vm11, 0, %v1135_v59  ;;  %v343_v32 = vsel %vm258_vm6, %v342_v58, %v1486_v15  ;;  %vm1584_vm12 = vcmp.le.f32.partialorder %v464_v20, 0.7853982 }
 0x129   :  { %v536_v10 = vsub.s32 32, %v535_v6  ;;  %v540_v13 = vsub.s32 4294967266, %v535_v6  ;;  %v211_v8 = vsel %vm209_vm9, %v210_v38, %v1559_v29  ;;  %v551_v11 = vsel %vm466_vm7, %v550_v62, %v1518_v60 }
 0x12a   :  { %v339_v9 = vmul.f32 %v338_v5, %v336_v4  ;;  %v212_v30 = vadd.s32 %v211_v8, %v207_v31  ;;  %v1592_v12 = vshrl.u32 %v372_v54, 5  ;;  %v537_v15 = vshll.u32 %v1529_v7, %v535_v6 }
 0x12b   :  { %v538_v45 = vshrl.u32 %v520_v2, %v536_v10  ;;  %v541_v19 = vadd.s32 127, %v540_v13  ;;  %v378_v20 = vshrl.u32 %v1302_v51, %v375_v3  ;;  %v381_v25 = vshrl.u32 %v1303_v53, %v375_v3 }
 0x12c   :  { %v340_v21 = vxor.u32 2147483648, %v339_v9  ;;  %v213_v24 = vadd.s32 536870912, %v212_v30  ;;  %v384_v26 = vshrl.u32 %v1304_v55, %v375_v3  ;;  %v377_v49 = vshll.u32 %v1301_v47, %v374_v61 }
 0x12d   :  { %v539_v27 = vor.u32 %v538_v45, %v537_v15  ;;  %v542_v28 = vshll.u32 %v541_v19, 23  ;;  %v380_v60 = vshll.u32 %v1302_v51, %v374_v61  ;;  %v383_v34 = vshll.u32 %v1303_v53, %v374_v61 }
 0x12e   :  { %v341_v33 = vsel %vm258_vm6, %v340_v21, %v339_v9  ;;  %v1602_v7 = vshrl.u32 %v213_v24, 30  ;;  %v387_v35 = vshrl.u32 %v1305_v57, %v375_v3  ;;  %v379_v37 = vor.u32 %v378_v20, %v377_v49 }
 0x12f   :  { %v543_v43 = vor.u32 4788187, %v542_v28  ;;  %v386_v39 = vshll.u32 %v1304_v55, %v374_v61  ;;  %v390_v41 = vshrl.u32 %v1306_v0, %v375_v3  ;;  %v344_v29 = vsel %vm1571_vm10, %v1392_v16, %v341_v33 }
 0x130   :  { %v215_v51 = vshll.u32 %v1602_v7, 30  ;;  %v382_v48 = vor.u32 %v381_v25, %v380_v60  ;;  %v385_v52 = vor.u32 %v384_v26, %v383_v34  ;;  %v546_v58 = vcvt.s32.f32 %v539_v27 }
 0x131   :  { %v544_v54 = vand.u32 2147483647, %v543_v43  ;;  %v388_v59 = vor.u32 %v387_v35, %v386_v39  ;;  %v389_v53 = vshll.u32 %v1305_v57, %v374_v61  ;;  %v345_v42 = vsel %vm1571_vm10, 0, %v343_v32 }
 0x132   :  { %v1617_v55 = vsel %vm1584_vm12, 0, %v551_v11  ;;  %v1619_v0 = vsub.s32 %v212_v30, %v215_v51  ;;  %v376_v50 = vshrl.u32 %v1301_v47, %v375_v3  ;;  %1209 = vcosq.f32 %v344_v29 }
 0x133   :  { %v547_v62 = vmul.f32 %v546_v58, %v544_v54  ;;  %v391_v2 = vor.u32 %v390_v41, %v389_v53  ;;  %vm395_vm13 = vcmp.lt.s32.totalorder %v1592_v12, 4  ;;  %1211 = vsinq.f32 %v344_v29 }
 0x134   :  { %v218_v38 = vsub.s32 0, %v1619_v0  ;;  %vm392_vm14 = vcmp.lt.s32.totalorder %v1592_v12, 1  ;;  %v397_v57 = vsel %vm395_vm13, %v385_v52, 2102212464  ;;  %vm394_vm15 = vcmp.lt.s32.totalorder %v1592_v12, 3 }
 0x135   :  { %v548_v61 = vxor.u32 2147483648, %v547_v62  ;;  %v400_v1 = vsel %vm392_vm14, %v379_v37, %v382_v48  ;;  %v401_v47 = vsel %vm395_vm13, %v388_v59, 920167782  ;;  %v396_v4 = vsel %vm392_vm14, %v376_v50, %v379_v37 }
 0x136   :  { %v1122_v3 = vmin.u32 %v218_v38, %v1619_v0  ;;  %v398_v5 = vsel %vm394_vm15, %v382_v48, %v397_v57  ;;  %v402_v6 = vsel %vm394_vm15, %v385_v52, %v401_v47  ;;  %vm393_vm0 = vcmp.lt.s32.totalorder %v1592_v12, 2 }
 0x137   :  { %v549_v31 = vsel %vm466_vm7, %v548_v61, %v547_v62  ;;  %v404_v32 = vsel %vm392_vm14, %v382_v48, %v385_v52  ;;  %v405_v10 = vsel %vm395_vm13, %v391_v2, 1326507024  ;;  %v557_v8 = vadd.s32 3, %v1617_v55 }
 0x138   :  { %v552_v13 = vsel %vm1584_vm12, %v1394_v17, %v549_v31  ;;  %v220_v9 = vclz %v1122_v3  ;;  %v403_v11 = vsel %vm393_vm0, %v400_v1, %v402_v6  ;;  %v399_v30 = vsel %vm393_vm0, %v396_v4, %v398_v5  ;;  %v990_v6 = vld [vmem:[%s1832_s2 + $0x8] sm:$0xff] }
 0x139   :  { %1213 = vcosq.f32 %v552_v13  ;;  %v406_v15 = vsel %vm394_vm15, %v388_v59, %v405_v10  ;;  %v408_v45 = vshll.u32 %v368_v63, 8  ;;  %v1649_v21 = vand.u32 127, %v980_v56 }
 0x13a   :  { %1215 = vsinq.f32 %v552_v13  ;;  %v1123_v19 = vadd.s32 4294967294, %v220_v9  ;;  %v407_v20 = vsel %vm393_vm0, %v404_v32, %v406_v15  ;;  %v349_v27 = vadd.s32 3, %v345_v42  ;;  %v992_v13 = vld [vmem:[%s1832_s2 + $0x18] sm:$0xff] }
 0x13b   :  { %v1651_v18 = vmul.u32.u64.low %v408_v45, %v407_v20  ;;  %v1652_v24 = vmul.u32.u64.high %v408_v45, %v407_v20, %v1651_v18  ;;  %v1654_v25 = vmul.u32.u64.low %v408_v45, %v403_v11  ;;  %v1655_v26 = vmul.u32.u64.high %v408_v45, %v403_v11, %v1654_v25  ;;  %986 = vrot.lane.b32.xlu0 %v1649_v21, %s1307_s0 }
 0x13c   :  { %vm1124_vm1 = vcmp.lt.s32.totalorder %v1123_v19, 0  ;;  %v1660_v44 = vpop.eup %1209  ;;  %v1662_v63 = vand.u32 3, %v345_v42  ;;  %v558_v12 = vand.u32 3, %v557_v8  ;;  %v208_v28 = vadd.s32 %v1558_v46, %v1555_v40 }
 0x13d   :  { %v223_v49 = vsel %vm1124_vm1, 0, %v1123_v19  ;;  %v1666_v60 = vpop.eup %1211  ;;  %v238_v35 = vsub.s32 4, %v1602_v7  ;;  %v415_v43 = vmul.u32 %v408_v45, %v399_v30  ;;  %vm417_vm2 = vc.u32 %v1652_v24, %v1654_v25 }
 0x13e   :  { %v224_v33 = vsub.s32 32, %v223_v49  ;;  %v228_v34 = vsub.s32 4294967266, %v223_v49  ;;  %v418_v37 = vadd.s32 1, %v1655_v26  ;;  %v982_v39 = vand.u32 1, %v1649_v21 }
 0x13f   :  { %vm154_vm3 = vcmp.lt.s32.totalorder %v1400_v22, 0  ;;  %v225_v41 = vshll.u32 %v1619_v0, %v223_v49  ;;  %vm556_vm4 = vweird.f32 %v1394_v17  ;;  %v350_v29 = vand.u32 3, %v349_v27 }
 0x140   :  { %v226_v40 = vshrl.u32 %v208_v28, %v224_v33  ;;  %v229_v46 = vadd.s32 127, %v228_v34  ;;  %v419_v51 = vsel %vm417_vm2, %v418_v37, %v1655_v26  ;;  %vm560_vm5 = vcmp.eq.s32.totalorder %v558_v12, 0 }
 0x141   :  { %v353_v48 = vxor.u32 2147483648, %v1666_v60  ;;  %v356_v52 = vxor.u32 2147483648, %v1660_v44  ;;  %v420_v59 = vadd.s32 %v419_v51, %v415_v43  ;;  %vm563_vm6 = vcmp.eq.s32.totalorder %v558_v12, 2 }
 0x142   :  { %v227_v54 = vor.u32 %v226_v40, %v225_v41  ;;  %v230_v58 = vshll.u32 %v229_v46, 23  ;;  %vm1681_vm7 = vcmp.eq.s32.totalorder %v982_v39, 0  ;;  %vm348_vm8 = vweird.f32 %v1392_v16  ;;  %v1040_v41 = vld [vmem:[#allocation2 + $0x8] sm:$0xff] }
 0x143   :  { %v1679_v53 = vpop.eup %1213  ;;  %vm351_vm9 = vcmp.lt.s32.totalorder %v350_v29, 2  ;;  %vm352_vm10 = vcmp.eq.s32.totalorder %v350_v29, 0  ;;  %v421_v62 = vadd.s32 536870912, %v420_v59  ;;  %vm355_vm11 = vcmp.eq.s32.totalorder %v350_v29, 2 }
 0x144   :  { %v1216_v0 = vpop.eup %1215  ;;  %v231_v50 = vor.u32 4788187, %v230_v58  ;;  %v564_v2 = vxor.u32 2147483648, %v1679_v53  ;;  %v234_v38 = vcvt.s32.f32 %v227_v54  ;;  %v354_v61 = vsel %vm352_vm10, %v1660_v44, %v353_v48 }
 0x145   :  { %v561_v57 = vxor.u32 2147483648, %v1216_v0  ;;  %v357_v1 = vsel %vm355_vm11, %v356_v52, %v1666_v60  ;;  %v1689_v3 = vshrl.u32 %v421_v62, 30  ;;  %v1308_v31 = vmov -1.0  }
 0x146   :  { %v232_v47 = vand.u32 2147483647, %v231_v50  ;;  %v565_v4 = vsel %vm563_vm6, %v564_v2, %v1216_v0  ;;  %v358_v5 = vsel %vm351_vm9, %v354_v61, %v357_v1  ;;  %v1697_v32 = vsel %vm1681_vm7, 1.0, %v1308_v31 }
 0x147   :  { %vm559_vm12 = vcmp.lt.s32.totalorder %v558_v12, 2  ;;  %v562_v10 = vsel %vm560_vm5, %v1679_v53, %v561_v57  ;;  %v359_v8 = vsel %vm348_vm8, nan, %v358_v5  ;;  %v423_v11 = vshll.u32 %v1689_v3, 30 }
 0x148   :  { %v235_v9 = vmul.f32 %v234_v38, %v232_v47  ;;  %v566_v30 = vsel %vm559_vm12, %v562_v10, %v565_v4  ;;  %vm766_vm13 = vcmp.eq.s32.totalorder %v1662_v63, 0  ;;  %v239_v15 = vsel %vm154_vm3, %v238_v35, %v1602_v7 }
 0x149   :  { %v567_v45 = vsel %vm556_vm4, nan, %v566_v30  ;;  %v994_v19 = vmul.f32 %v990_v6, %v359_v8  ;;  %v768_v20 = vsel %vm766_vm13, %v1660_v44, %v353_v48  ;;  %v424_v26 = vsub.s32 %v420_v59, %v423_v11 }
 0x14a   :  { %v236_v18 = vxor.u32 2147483648, %v235_v9  ;;  %v996_v27 = vmul.f32 %v992_v13, %v567_v45  ;;  %v970_v12 = vand.u32 3, %v1617_v55  ;;  %vm153_vm14 = vcmp.le.f32.partialorder %v152_v36, 0.7853982 }
 0x14b   :  { %v998_v28 = vmul.f32 %v994_v19, %v1697_v32  ;;  %v241_v7 = vsel %vm153_vm14, 0, %v239_v15  ;;  %v426_v33 = vsub.s32 0, %v424_v26  ;;  %vm769_vm15 = vcmp.eq.s32.totalorder %v1662_v63, 2 }
 0x14c   :  { %v237_v49 = vsel %vm154_vm3, %v236_v18, %v235_v9  ;;  %v1000_v44 = vmul.f32 %v996_v27, %v1697_v32  ;;  %vm765_vm0 = vcmp.lt.s32.totalorder %v1662_v63, 2  ;;  %v771_v55 = vsel %vm769_vm15, %v356_v52, %v1666_v60  ;;  %v1042_v60 = vld [vmem:[#allocation2 + $0x18] sm:$0xff]  ;;  %v1039_v9 = vld [vmem:[#allocation2] sm:$0xff] }
 0x14d   :  { %v240_v34 = vsel %vm153_vm14, %v1400_v22, %v237_v49  ;;  %1003 = vrot.lane.b32.xlu1 %v998_v28, %s1307_s0  ;;  %v1130_v36 = vmin.u32 %v426_v33, %v424_v26  ;;  %v772_v35 = vsel %vm765_vm0, %v768_v20, %v771_v55  ;;  %v245_v37 = vadd.s32 3, %v241_v7 }
 0x14e   :  { %1217 = vcosq.f32 %v240_v34  ;;  %1007 = vrot.lane.b32.xlu0 %v1000_v44, %s1307_s0  ;;  %v773_v43 = vsel %vm348_vm8, nan, %v772_v35  ;;  %vm972_vm1 = vcmp.eq.s32.totalorder %v970_v12, 0  ;;  %vm975_vm2 = vcmp.eq.s32.totalorder %v970_v12, 2 }
 0x14f   :  { %1219 = vsinq.f32 %v240_v34  ;;  %v428_v39 = vclz %v1130_v36  ;;  %v1729_v40 = vmul.f32 %v990_v6, %v773_v43  ;;  %v974_v46 = vsel %vm972_vm1, %v1679_v53, %v561_v57 }
 0x150   :  { %vm971_vm3 = vcmp.lt.s32.totalorder %v970_v12, 2  ;;  %v977_v29 = vsel %vm975_vm2, %v564_v2, %v1216_v0  ;;  %v1733_v48 = vmul.f32 %v1040_v41, %v773_v43  ;;  %v246_v16 = vand.u32 3, %v245_v37 }
 0x151   :  { %v1131_v63 = vadd.s32 4294967294, %v428_v39  ;;  %v978_v51 = vsel %vm971_vm3, %v974_v46, %v977_v29  ;;  %v1044_v58 = vmul.f32 %v1040_v41, %v359_v8  ;;  %v661_v42 = vand.u32 3, %v241_v7  ;;  %v989_v8 = vld [vmem:[%s1832_s2] sm:$0xff]  ;;  %v991_v29 = vld [vmem:[%s1832_s2 + $0x10] sm:$0xff]  ;;  %s1311_s2 = smov [#allocation5]  }
 0x152   :  { %1011 = vrot.lane.b32.xlu0 %v998_v28, %s1309_s21  ;;  %v979_v52 = vsel %vm556_vm4, nan, %v978_v51  ;;  %v416_v0 = vadd.s32 %v1654_v25, %v1652_v24  ;;  %vm247_vm6 = vcmp.lt.s32.totalorder %v246_v16, 2  ;;  %vm251_vm4 = vcmp.eq.s32.totalorder %v246_v16, 2  ;;  %v1041_v51 = vld [vmem:[#allocation2 + $0x10] sm:$0xff]  ;;  %s1088_s26 = sshll.u32 %s1311_s2, 4  ;;  %s1089_s26 = int_to_ptr.vmem [resolvable:$true] %s1088_s26 }
 0x153   :  { %vm1132_vm5 = vcmp.lt.s32.totalorder %v1131_v63, 0  ;;  %v1737_v59 = vmul.f32 %v992_v13, %v979_v52  ;;  %v1739_v53 = vmul.f32 %v1042_v60, %v979_v52  ;;  %v1048_v47 = vmul.f32 %v1044_v58, %v1697_v32  ;;  %s1247_s27 = scalar_lea.vmem %s1089_s26, 512  ;;  %p1252_p9 = scmp.lt.s32.totalorder %s1089_s26, %s1089_s26 }
 0x154   :  { %v431_v54 = vsel %vm1132_vm5, 0, %v1131_v63  ;;  %v1046_v4 = vmul.f32 %v1042_v60, %v567_v45  ;;  %vm666_vm7 = vcmp.eq.s32.totalorder %v661_v42, 2  ;;  %vm248_vm8 = vcmp.eq.s32.totalorder %v246_v16, 0  ;;  %p1248_p8 = scmp.ne.s32.totalorder %s1089_s26, %s1247_s27  ;;  %p1253_p10 = scmp.lt.s32.totalorder %s1247_s27, %s1247_s27 }
 0x155   :  { %v432_v50 = vsub.s32 32, %v431_v54  ;;  %v436_v62 = vsub.s32 4294967266, %v431_v54  ;;  %v433_v38 = vshll.u32 %v424_v26, %v431_v54  ;;  %vm663_vm9 = vcmp.eq.s32.totalorder %v661_v42, 0 }
 0x156   :  { %1015 = vrot.lane.b32.xlu0 %v1000_v44, %s1309_s21  ;;  %vm662_vm10 = vcmp.lt.s32.totalorder %v661_v42, 2  ;;  %vm244_vm11 = vweird.f32 %v1400_v22  ;;  %v1050_v15 = vmul.f32 %v1046_v4, %v1697_v32  ;;  %v446_v49 = vsub.s32 4, %v1689_v3  ;;  %p1254_p11 = por %p1253_p10, %p1252_p9 }
 0x157   :  { %v434_v57 = vshrl.u32 %v416_v0, %v432_v50  ;;  %v437_v17 = vadd.s32 127, %v436_v62  ;;  %vm362_vm12 = vcmp.lt.s32.totalorder %v1402_v23, 0  ;;  %vm361_vm13 = vcmp.le.f32.partialorder %v360_v14, 0.7853982 }
 0x158   :  { %v1218_v2 = vpop.eup %1217  ;;  %v447_v34 = vsel %vm362_vm12, %v446_v49, %v1689_v3  ;;  %vm452_vm5 = vweird.f32 %v1402_v23  ;;  %p1255_p12 = pnand %p1254_p11, %p1248_p8 }
 0x159   :  { %v1220_v61 = vpop.eup %1219  ;;  %v252_v1 = vxor.u32 2147483648, %v1218_v2  ;;  %v435_v6 = vor.u32 %v434_v57, %v433_v38  ;;  %v438_v31 = vshll.u32 %v437_v17, 23  ;;  %v449_v36 = vsel %vm361_vm13, 0, %v447_v34 }
 0x15a   :  { %v249_v5 = vxor.u32 2147483648, %v1220_v61  ;;  %1053 = vrot.lane.b32.xlu0 %v1048_v47, %s1307_s0  ;;  %v453_v35 = vadd.s32 3, %v449_v36  ;;  %v867_v37 = vand.u32 3, %v449_v36 }
 0x15b   :  { %v253_v24 = vsel %vm251_vm4, %v252_v1, %v1220_v61  ;;  %v668_v25 = vsel %vm666_vm7, %v252_v1, %v1220_v61  ;;  %v439_v13 = vor.u32 4788187, %v438_v31  ;;  %v442_v18 = vcvt.s32.f32 %v435_v6 }
 0x15c   :  { %v250_v10 = vsel %vm248_vm8, %v1218_v2, %v249_v5  ;;  %v665_v11 = vsel %vm663_vm9, %v1218_v2, %v249_v5  ;;  %v454_v43 = vand.u32 3, %v453_v35  ;;  %vm872_vm15 = vcmp.eq.s32.totalorder %v867_v37, 2 }
 0x15d   :  { %v254_v30 = vsel %vm247_vm6, %v250_v10, %v253_v24  ;;  %v669_v45 = vsel %vm662_vm10, %v665_v11, %v668_v25  ;;  %v440_v20 = vand.u32 2147483647, %v439_v13  ;;  %vm869_vm1 = vcmp.eq.s32.totalorder %v867_v37, 0 }
 0x15e   :  { %v255_v19 = vsel %vm244_vm11, nan, %v254_v30  ;;  %v670_v26 = vsel %vm244_vm11, nan, %v669_v45  ;;  %1057 = vrot.lane.b32.xlu0 %v1050_v15, %s1307_s0  ;;  %vm459_vm14 = vcmp.eq.s32.totalorder %v454_v43, 2  ;;  %vm456_vm0 = vcmp.eq.s32.totalorder %v454_v43, 0 }
 0x15f   :  { %v1753_v27 = vmul.f32 %v1039_v9, %v670_v26  ;;  %v1755_v12 = vmul.f32 %v989_v8, %v670_v26  ;;  %v443_v28 = vmul.f32 %v442_v18, %v440_v20  ;;  %v993_v7 = vmul.f32 %v989_v8, %v255_v19 }
 0x160   :  { %vm455_vm2 = vcmp.lt.s32.totalorder %v454_v43, 2  ;;  %vm868_vm3 = vcmp.lt.s32.totalorder %v867_v37, 2  ;;  %v1043_v38 = vmul.f32 %v1039_v9, %v255_v19  ;;  %v1019_v61 = vshrl.u32 %v980_v56, 7 }
 0x161   :  { %v444_v22 = vxor.u32 2147483648, %v443_v28  ;;  %v997_v55 = vmul.f32 %v993_v7, %v1697_v32  ;;  %v985_v1 = vxor.u32 1, %v1649_v21  ;;  %v1310_v5 = vmov 0  }
 0x162   :  { %1061 = vrot.lane.b32.xlu0 %v1048_v47, %s1309_s21  ;;  %v1047_v57 = vmul.f32 %v1043_v38, %v1697_v32  ;;  %v1020_v47 = vsub.s32 0, %v1019_v61 }
 0x163   :  { %v445_v33 = vsel %vm362_vm12, %v444_v22, %v443_v28 }
 0x164   :  { %v448_v44 = vsel %vm361_vm13, %v1402_v23, %v445_v33 }
 0x165   :  { %1221 = vcosq.f32 %v448_v44 }
 0x166   :  { %1223 = vsinq.f32 %v448_v44  ;;  %1001 = vrot.lane.b32.xlu0 %v997_v55, %s1307_s0 }
 0x16a   :  { %1065 = vrot.lane.b32.xlu0 %v1050_v15, %s1309_s21 }
 0x16f   :  { %v1222_v39 = vpop.eup %1221 }
 0x170   :  { %v1224_v41 = vpop.eup %1223  ;;  %v460_v14 = vxor.u32 2147483648, %v1222_v39 }
 0x171   :  { %v457_v46 = vxor.u32 2147483648, %v1224_v41 }
 0x172   :  { %v461_v3 = vsel %vm459_vm14, %v460_v14, %v1224_v41  ;;  %v874_v63 = vsel %vm872_vm15, %v460_v14, %v1224_v41 }
 0x173   :  { %v458_v60 = vsel %vm456_vm0, %v1222_v39, %v457_v46  ;;  %v871_v16 = vsel %vm869_vm1, %v1222_v39, %v457_v46 }
 0x174   :  { %v462_v52 = vsel %vm455_vm2, %v458_v60, %v461_v3  ;;  %v875_v54 = vsel %vm868_vm3, %v871_v16, %v874_v63 }
 0x175   :  { %v463_v58 = vsel %vm452_vm5, nan, %v462_v52  ;;  %v876_v42 = vsel %vm452_vm5, nan, %v875_v54 }
 0x176   :  { %v995_v0 = vmul.f32 %v991_v29, %v463_v58  ;;  %v1029_v50 = vmul.f32 %v991_v29, %v876_v42  ;;  %v1771_v62 = vmul.f32 %v1041_v51, %v876_v42  ;;  %v1045_v23 = vmul.f32 %v1041_v51, %v463_v58 }
 0x178   :  { %v999_v2 = vmul.f32 %v995_v0, %v1697_v32  ;;  %v1049_v17 = vmul.f32 %v1045_v23, %v1697_v32 }
 0x17a   :  { %1005 = vrot.lane.b32.xlu1 %v999_v2, %s1307_s0 }
 0x17e   :  { %1009 = vrot.lane.b32.xlu1 %v997_v55, %s1309_s21 }
 0x182   :  { %1013 = vrot.lane.b32.xlu1 %v999_v2, %s1309_s21 }
 0x186   :  { %1051 = vrot.lane.b32.xlu1 %v1047_v57, %s1307_s0 }
 0x18a   :  { %1055 = vrot.lane.b32.xlu1 %v1049_v17, %s1307_s0 }
 0x18e   :  { %1059 = vrot.lane.b32.xlu1 %v1047_v57, %s1309_s21 }
 0x192   :  { %1063 = vrot.lane.b32.xlu1 %v1049_v17, %s1309_s21 }
 0x1ad   :  { %v987_v4 = vpop.permute.xlu0 %986 }
 0x1ae   :  { %vm988_vm6 = vcmp.eq.s32.totalorder %v987_v4, %v985_v1 }
 0x1af   :  { %v1017_v6 = vsel %vm988_vm6, 1, %v1310_v5 }
 0x1b0   :  { %v1021_v31 = vrot.slane %v1017_v6, %v1020_v47 }
 0x1b2   :  { %vm1022_vm4 = vcmp.eq.s32.totalorder %v1021_v31, 1 }
 0x1bf   :  { %v1004_v25 = vpop.permute.xlu1 %1003 }
 0x1c0   :  { %v1008_v24 = vpop.permute.xlu0 %1007 }
 0x1c4   :  { %v1012_v32 = vpop.permute.xlu0 %1011 }
 0x1c5   :  { %v1024_v10 = vsel %vm1022_vm4, %v1004_v25, %v1012_v32 }
 0x1c6   :  { %v1032_v13 = vadd.f32 %v1729_v40, %v1024_v10 }
 0x1c8   :  { %1036 = vst [vmem:[#allocation5 + $0x8] sm:$0xff] %v1032_v13  ;;  %v1016_v8 = vpop.permute.xlu0 %1015 }
 0x1c9   :  { %v1026_v56 = vsel %vm1022_vm4, %v1008_v24, %v1016_v8 }
 0x1ca   :  { %v1034_v21 = vadd.f32 %v1737_v59, %v1026_v56 }
 0x1cc   :  { %1038 = vst [vmem:[#allocation5 + $0x18] sm:$0xff] %v1034_v21  ;;  %v1054_v9 = vpop.permute.xlu0 %1053 }
 0x1d0   :  { %v1058_v11 = vpop.permute.xlu0 %1057 }
 0x1d4   :  { %v1062_v30 = vpop.permute.xlu0 %1061 }
 0x1d5   :  { %v1068_v15 = vsel %vm1022_vm4, %v1054_v9, %v1062_v30 }
 0x1d6   :  { %v1076_v45 = vadd.f32 %v1733_v48, %v1068_v15 }
 0x1d8   :  { %1080 = vst [vmem:[#allocation6 + $0x8] sm:$0xff] %v1076_v45  ;;  %v1002_v19 = vpop.permute.xlu0 %1001 }
 0x1dc   :  { %v1066_v20 = vpop.permute.xlu0 %1065 }
 0x1dd   :  { %v1070_v18 = vsel %vm1022_vm4, %v1058_v11, %v1066_v20 }
 0x1de   :  { %v1078_v40 = vadd.f32 %v1739_v53, %v1070_v18 }
 0x1e0   :  { %1082 = vst [vmem:[#allocation6 + $0x18] sm:$0xff] %v1078_v40 }
 0x1ec   :  { %v1006_v26 = vpop.permute.xlu1 %1005 }
 0x1f0   :  { %v1010_v28 = vpop.permute.xlu1 %1009 }
 0x1f1   :  { %v1023_v59 = vsel %vm1022_vm4, %v1002_v19, %v1010_v28 }
 0x1f2   :  { %v1031_v49 = vadd.f32 %v1755_v12, %v1023_v59 }
 0x1f4   :  { %v1014_v7 = vpop.permute.xlu1 %1013  ;;  %1035 = vst [vmem:[#allocation5] sm:$0xff] %v1031_v49 }
 0x1f5   :  { %v1025_v48 = vsel %vm1022_vm4, %v1006_v26, %v1014_v7 }
 0x1f6   :  { %v1033_v22 = vadd.f32 %v1029_v50, %v1025_v48 }
 0x1f8   :  { %1037 = vst [vmem:[#allocation5 + $0x10] sm:$0xff] %v1033_v22  ;;  %v1052_v33 = vpop.permute.xlu1 %1051 }
 0x1f9   :  { %1258 = shalt.err (!%p1255_p12)
}
 0x1fa   :  { %s1259_s7 = scalar_lea.hbm %s1834_s4, 512 }
 0x1fb   :  { %p1260_p13 = scmp.ne.s32.totalorder %s1834_s4, %s1259_s7  ;;  %p1263_p0 = scmp.lt.u32.totalorder %s1259_s7, %s1834_s4 }
 0x1fd   :  { %p1265_p1 = pnand %p1263_p0, %p1260_p13 }
 0x1ff   :  { %1268 = shalt.err (!%p1265_p1)
}
 0x200   :  { %1094 = dma.vmem_to_hbm [thread:$0]  %s1089_s26, 512, %s1834_s4, [#allocation4], %s1298_s28, %s1298_s28, %s1299_s29   ;;  %v1056_v53 = vpop.permute.xlu1 %1055 }
 0x201   :  { %s1312_s13 = smov [#allocation6]  }
 0x202   :  { %s1100_s14 = sshll.u32 %s1312_s13, 4  ;;  %s1101_s14 = int_to_ptr.vmem [resolvable:$true] %s1100_s14 }
 0x203   :  { %s1269_s15 = scalar_lea.vmem %s1101_s14, 512  ;;  %p1274_p3 = scmp.lt.s32.totalorder %s1101_s14, %s1101_s14 }
 0x204   :  { %v1060_v12 = vpop.permute.xlu1 %1059  ;;  %p1270_p2 = scmp.ne.s32.totalorder %s1101_s14, %s1269_s15  ;;  %p1275_p4 = scmp.lt.s32.totalorder %s1269_s15, %s1269_s15 }
 0x205   :  { %v1067_v34 = vsel %vm1022_vm4, %v1052_v33, %v1060_v12 }
 0x206   :  { %v1075_v44 = vadd.f32 %v1753_v27, %v1067_v34  ;;  %p1276_p5 = por %p1275_p4, %p1274_p3 }
 0x208   :  { %1079 = vst [vmem:[#allocation6] sm:$0xff] %v1075_v44  ;;  %v1064_v55 = vpop.permute.xlu1 %1063  ;;  %p1277_p6 = pnand %p1276_p5, %p1270_p2 }
 0x209   :  { %v1069_v36 = vsel %vm1022_vm4, %v1056_v53, %v1064_v55 }
 0x20a   :  { %v1077_v35 = vadd.f32 %v1771_v62, %v1069_v36 }
 0x20c   :  { %1081 = vst [vmem:[#allocation6 + $0x10] sm:$0xff] %v1077_v35 }
 0x20d   :  { %1280 = shalt.err (!%p1277_p6)
}
 0x20e   :  { %s1281_s17 = scalar_lea.hbm %s1835_s5, 512 }
 0x20f   :  { %p1282_p7 = scmp.ne.s32.totalorder %s1835_s5, %s1281_s17  ;;  %p1285_p8 = scmp.lt.u32.totalorder %s1281_s17, %s1835_s5 }
 0x211   :  { %p1287_p9 = pnand %p1285_p8, %p1282_p7 }
 0x213   :  { %1290 = shalt.err (!%p1287_p9)
}
 0x214   :  { %1106 = dma.vmem_to_hbm [thread:$0]  %s1101_s14, 512, %s1835_s5, [#allocation7], %s1298_s28, %s1298_s28, %s1299_s29  }
 0x215   :  { %1293 = dma.done.wait [#allocation4], 512  }
 0x216   :  { %1294 = vsyncadd [#allocation4], 4294966784 }
 0x217   :  { %1295 = dma.done.wait [#allocation7], 512  }
 0x218   :  { %1296 = vsyncadd [#allocation7], 4294966784 }
 0x219   :  { %1113 = vsyncpa [#allocation3], 1 }
 0x21a   :  { %1114 = vsyncpa [#allocation4], 1 }
 0x21b   :  { %1115 = vsyncpa [#allocation7], 1 }

</bundles_post_ra>
